<compile_context>
chip_gen: v7x
topology: tpu7x:2x2x1
jax: 0.10.0
libtpu: 0.0.40
codegen_flags: <defaults>
</compile_context>

<pallas_src>
import functools

import jax
import jax.numpy as jnp
import numpy as np
from jax import lax
from jax.experimental import pallas as pl
from jax.experimental.pallas import tpu as pltpu

# MXU-friendly operand dtype on real TPUs; plain f32 elsewhere (the CPU
# interpreter used for correctness checks has no bf16 x bf16 -> f32 dot).
_MM_DTYPE = jnp.bfloat16 if jax.default_backend() == "tpu" else jnp.float32


# ----------------------------------------------------------------------------
# Fused, destination-row-blocked kernel: 3 GATConvs + node-type combine + ReLU
# ----------------------------------------------------------------------------
def _gat_block_kernel(nt1h_ref, hf_ref, hb_ref, ea_ref, dst1h_ref, s_ref,
                      dt_ref, adj_ref, wx_ref, wres_ref, wedge_ref, wasrc_ref,
                      wadst_ref, atte_ref, bias_ref, out_ref, *, c_out):
    f32 = jnp.float32
    n_conv = 3
    C = c_out
    mm = s_ref.dtype  # matmul operand dtype (bf16 on TPU, f32 in interpret)

    # ---- source-side projections (full graph; recomputed per row block) -----
    X = jnp.dot(hf_ref[...], wx_ref[...], preferred_element_type=f32)       # (N, 3C)
    a_src = jnp.dot(hf_ref[...], wasrc_ref[...], preferred_element_type=f32)  # (N, 3)
    e_proj = jnp.dot(ea_ref[...], wedge_ref[...], preferred_element_type=f32)  # (E, 3C)
    a_edge = jnp.dot(e_proj, atte_ref[...], preferred_element_type=f32)     # (E, 3)

    # ---- per-edge logits, keeping only the conv of each edge's dst type -----
    dst1h = dst1h_ref[...]                                                   # (E, 3)
    e_src = jnp.dot(s_ref[...], a_src.astype(mm), preferred_element_type=f32)  # (E, 3)
    e_src_sel = jnp.sum(e_src * dst1h, axis=1, keepdims=True)                # (E, 1)
    e_edge_sel = jnp.sum(a_edge * dst1h, axis=1, keepdims=True)              # (E, 1)

    nt1h = nt1h_ref[...]                                                     # (TN, 3)
    a_dst = jnp.dot(hb_ref[...], wadst_ref[...], preferred_element_type=f32)  # (TN, 3)
    a_dst_sel = jnp.sum(a_dst * nt1h, axis=1, keepdims=True)                 # (TN, 1)
    # Scatter the per-destination attention term onto the edges of this row
    # block.  Edges whose destination is outside the block get 0 here, but
    # they are zeroed again by DT_blk in the dense scatter below.
    # TODO(synk): if Mosaic materializes an XLU transpose for this contraction
    # at large E, pass the (E, N) destination incidence as an extra input.
    e_dst_sel = lax.dot_general(dt_ref[...], a_dst_sel.astype(mm),
                                (((0,), (0,)), ((), ())),
                                preferred_element_type=f32)                  # (E, 1)

    logit = e_src_sel + e_edge_sel + e_dst_sel                               # (E, 1)
    logit = jnp.where(logit > 0, logit, 0.2 * logit)                         # LeakyReLU(0.2)

    # ---- dense scatter into (dst row block, src) + masked softmax (f32) -----
    lw = logit.astype(mm)                                                    # (E, 1)
    dense = jnp.dot(dt_ref[...], lw * s_ref[...],
                    preferred_element_type=f32)                              # (TN, N)
    mask = adj_ref[...] > 0.5                                                # (TN, N)
    masked = jnp.where(mask, dense, -1e30)
    m = jnp.max(masked, axis=-1, keepdims=True)
    p = jnp.exp(masked - m)            # masked entries underflow to 0
    denom = jnp.sum(p, axis=-1, keepdims=True)
    attn = p * (1.0 / denom)                                                 # (TN, N)

    # ---- aggregate, residual, bias, node-type column select, ReLU -----------
    agg = jnp.dot(attn.astype(mm), X.astype(mm),
                  preferred_element_type=f32)                                # (TN, 3C)
    res = jnp.dot(hb_ref[...], wres_ref[...], preferred_element_type=f32)    # (TN, 3C)
    tot = agg + res + bias_ref[...]                                          # (TN, 3C)
    o = jnp.zeros((nt1h.shape[0], C), f32)
    for c in range(n_conv):
        o = o + nt1h[:, c:c + 1] * tot[:, c * C:(c + 1) * C]
    out_ref[...] = jnp.maximum(o, 0.0)


def fused_cnf_block(nt1h, h, ea, dst1h, S, DT, adj, w_x, w_res, w_edge,
                    w_asrc, w_adst, att_e, bias_all, *, c_out, row_block):
    N, c_in = h.shape
    E, edge_dim = ea.shape
    assert N % row_block == 0, "N must be divisible by the destination row block"
    grid = (N // row_block,)

    def rows(ncols):
        return pl.BlockSpec((row_block, ncols), lambda i: (i, 0))

    def full2d(a):
        return pl.BlockSpec(a.shape, lambda i: (0, 0))

    in_specs = [
        rows(3),            # nt1h: node-type one-hot, dst row block
        full2d(h),          # h: full (source side features)
        rows(c_in),         # h: dst row block (residual + dst attention)
        full2d(ea),         # edge_attr (with self-loop rows)
        full2d(dst1h),      # per-edge destination-type one-hot
        full2d(S),          # (E, N) source incidence
        rows(E),            # (N, E) destination incidence, dst row block
        rows(N),            # (N, N) static adjacency mask, dst row block
        full2d(w_x), full2d(w_res), full2d(w_edge),
        full2d(w_asrc), full2d(w_adst), full2d(att_e), full2d(bias_all),
    ]
    out_spec = pl.BlockSpec((row_block, c_out), lambda i: (i, 0))

    flops = int(2 * (N * E * N                      # dense scatter matmul
                     + N * N * 3 * c_out            # aggregation
                     + 2 * N * c_in * 3 * c_out     # node projections
                     + E * edge_dim * 3 * c_out))   # edge projection
    bytes_accessed = int(4 * (2 * E * N + N * N + 2 * N * c_in
                              + E * edge_dim + N * c_out))

    kern = functools.partial(_gat_block_kernel, c_out=c_out)
    return pl.pallas_call(
        kern,
        out_shape=jax.ShapeDtypeStruct((N, c_out), jnp.float32),
        grid=grid,
        in_specs=in_specs,
        out_specs=out_spec,
        compiler_params=pltpu.CompilerParams(
            # Row blocks are independent -> megacore-friendly on v7x.
            dimension_semantics=("parallel",),
            # TODO(synk): size per generation (bigger on v5e/v6e's 128 MiB
            # VMEM, stay well under v7x's 64 MiB per TensorCore).
            vmem_limit_bytes=48 * 1024 * 1024),
        cost_estimate=pl.CostEstimate(
            flops=flops, transcendentals=N * N, bytes_accessed=bytes_accessed),
    )(nt1h, h, h, ea, dst1h, S, DT, adj, w_x, w_res, w_edge, w_asrc, w_adst,
      att_e, bias_all)


# ----------------------------------------------------------------------------
# Glue
# ----------------------------------------------------------------------------
def add_self_loops(edge_index, edge_attr, num_nodes):
    """PyG add_self_loops with fill_value='mean': per-destination mean attr."""
    dst = edge_index[1]
    seg_sum = jax.ops.segment_sum(edge_attr, dst, num_segments=num_nodes)
    cnt = jax.ops.segment_sum(jnp.ones((edge_attr.shape[0],), edge_attr.dtype),
                              dst, num_segments=num_nodes)
    loop_attr = seg_sum / jnp.maximum(cnt, 1.0)[:, None]
    loop_idx = jnp.arange(num_nodes, dtype=edge_index.dtype)
    ei = jnp.concatenate([edge_index, jnp.stack([loop_idx, loop_idx])], axis=1)
    ea = jnp.concatenate([edge_attr, loop_attr], axis=0)
    return ei, ea


def _pack_params(params_v, params_r, params_i):
    """Batch the three convs' parameters into lane-dense matrices."""
    ps = (params_v, params_r, params_i)
    hp = lax.Precision.HIGHEST
    w_x = jnp.concatenate([p["w_src"] for p in ps], axis=1)         # (Cin, 3C)
    w_res = jnp.concatenate([p["w_res"] for p in ps], axis=1)       # (Cin, 3C)
    w_edge = jnp.concatenate([p["w_edge"] for p in ps], axis=1)     # (Ed, 3C)
    # Fold attention vectors into the projection: (h @ W) @ a == h @ (W @ a).
    w_asrc = jnp.concatenate(
        [jnp.dot(p["w_src"], p["att_src"], precision=hp) for p in ps], axis=1)  # (Cin, 3)
    w_adst = jnp.concatenate(
        [jnp.dot(p["w_src"], p["att_dst"], precision=hp) for p in ps], axis=1)  # (Cin, 3)
    att_e = jax.scipy.linalg.block_diag(*[p["att_edge"] for p in ps])           # (3C, 3)
    bias_all = jnp.concatenate([p["bias"] for p in ps], axis=1)                 # (1, 3C)
    return w_x, w_res, w_edge, w_asrc, w_adst, att_e, bias_all


def _pick_row_block(n):
    for tb in (512, 256, 128, 64, 32, 16, 8):
        if tb <= n // 2 and n % tb == 0:
            return tb
    return n


@jax.jit
def cnf_processing_block(h, edge_index, edge_attr, node_type,
                         params_v, params_r, params_i):
    N = h.shape[0]
    c_out = params_v["w_src"].shape[1]
    ei, ea = add_self_loops(edge_index, edge_attr, N)
    src, dst = ei[0], ei[1]

    mm = _MM_DTYPE
    # Dense incidence formulation assumes no duplicate (src, dst) pairs.
    S = jax.nn.one_hot(src, N, dtype=mm)                         # (E, N)
    DT = jax.nn.one_hot(dst, N, dtype=mm).T                      # (N, E)
    # Static-graph adjacency mask, hoisted out of the kernel.
    adj = jnp.zeros((N, N), jnp.float32).at[dst, src].set(1.0)   # (N, N)
    nt1h = jax.nn.one_hot(node_type, 3, dtype=jnp.float32)       # (N, 3)
    dst1h = jax.nn.one_hot(node_type[dst], 3, dtype=jnp.float32)  # (E, 3)

    w_x, w_res, w_edge, w_asrc, w_adst, att_e, bias_all = _pack_params(
        params_v, params_r, params_i)

    return fused_cnf_block(
        nt1h, h.astype(mm), ea.astype(mm), dst1h, S, DT, adj,
        w_x.astype(mm), w_res.astype(mm), w_edge.astype(mm),
        w_asrc.astype(mm), w_adst.astype(mm),
        att_e.astype(jnp.float32), bias_all.astype(jnp.float32),
        c_out=c_out, row_block=_pick_row_block(N))


# ----------------------------------------------------------------------------
# Pure-JAX f32 reference (edge-wise segment softmax) for validation
# ----------------------------------------------------------------------------
def _gat_conv_ref(h, ei, ea, p):
    N = h.shape[0]
    hp = lax.Precision.HIGHEST
    x = jnp.dot(h, p["w_src"], precision=hp)
    res = jnp.dot(h, p["w_res"], precision=hp)
    e = jnp.dot(ea, p["w_edge"], precision=hp)
    a_s = jnp.dot(x, p["att_src"], precision=hp)[:, 0]
    a_d = jnp.dot(x, p["att_dst"], precision=hp)[:, 0]
    a_e = jnp.dot(e, p["att_edge"], precision=hp)[:, 0]
    src, dst = ei[0], ei[1]
    logit = a_s[src] + a_d[dst] + a_e
    logit = jnp.where(logit > 0, logit, 0.2 * logit)
    m = jax.ops.segment_max(logit, dst, num_segments=N)
    pexp = jnp.exp(logit - m[dst])
    denom = jax.ops.segment_sum(pexp, dst, num_segments=N)
    alpha = pexp / denom[dst]
    msg = alpha[:, None] * x[src]
    return jax.ops.segment_sum(msg, dst, num_segments=N) + res + p["bias"][0]


def cnf_processing_block_ref(h, edge_index, edge_attr, node_type,
                             params_v, params_r, params_i):
    N = h.shape[0]
    ei, ea = add_self_loops(edge_index, edge_attr, N)
    ov = _gat_conv_ref(h, ei, ea, params_v)
    orr = _gat_conv_ref(h, ei, ea, params_r)
    oi = _gat_conv_ref(h, ei, ea, params_i)
    nt = node_type[:, None]
    out = (jnp.where(nt == 0, ov, 0.0)
           + jnp.where(nt == 1, orr, 0.0)
           + jnp.where(nt == 2, oi, 0.0))
    return jnp.maximum(out, 0.0)


# ----------------------------------------------------------------------------
# Deterministic parameters / inputs
# ----------------------------------------------------------------------------
def make_gat_params(key, in_channels, out_channels, edge_dim):
    ks = jax.random.split(key, 7)
    scale = 0.1
    return {
        "w_src":    scale * jax.random.normal(ks[0], (in_channels, out_channels), jnp.float32),
        "w_res":    scale * jax.random.normal(ks[1], (in_channels, out_channels), jnp.float32),
        "w_edge":   scale * jax.random.normal(ks[2], (edge_dim, out_channels), jnp.float32),
        "att_src":  scale * jax.random.normal(ks[3], (out_channels, 1), jnp.float32),
        "att_dst":  scale * jax.random.normal(ks[4], (out_channels, 1), jnp.float32),
        "att_edge": scale * jax.random.normal(ks[5], (out_channels, 1), jnp.float32),
        "bias":     scale * jax.random.normal(ks[6], (1, out_channels), jnp.float32),
    }


if __name__ == "__main__":
    key = jax.random.PRNGKey(0)
    k_h, k_ea, k_pv, k_pr, k_pi = jax.random.split(key, 5)

    N = 16            # 8 variables, 4 redundant clauses, 4 irredundant clauses
    C_IN = 32         # in_channels == out_channels (forward uses zeros_like(h))
    C_OUT = 32
    EDGE_DIM = 8

    # Bipartite CNF-style edge list (no duplicate (src, dst) pairs).
    edges = []
    for c in range(8, 16):
        for t in range(3):
            v = (c * 3 + t) % 8
            edges.append((v, c))
            edges.append((c, v))
    edge_index = jnp.asarray(np.array(edges, dtype=np.int32).T)      # (2, 48)
    edge_attr = jax.random.normal(k_ea, (edge_index.shape[1], EDGE_DIM), jnp.float32)
    node_type = jnp.asarray(np.array([0] * 8 + [1] * 4 + [2] * 4, dtype=np.int32))
    h = jax.random.normal(k_h, (N, C_IN), jnp.float32)

    params_v = make_gat_params(k_pv, C_IN, C_OUT, EDGE_DIM)  # conv_variables
    params_r = make_gat_params(k_pr, C_IN, C_OUT, EDGE_DIM)  # conv_redundant
    params_i = make_gat_params(k_pi, C_IN, C_OUT, EDGE_DIM)  # conv_irredundant
    # (disambiguate_clauses=True -> three separate GATConvs)

    out = cnf_processing_block(h, edge_index, edge_attr, node_type,
                               params_v, params_r, params_i)
    out = jax.block_until_ready(out)

    ref = cnf_processing_block_ref(h, edge_index, edge_attr, node_type,
                                   params_v, params_r, params_i)
    # bf16 MXU operands on TPU -> slightly looser tolerance than pure f32.
    np.testing.assert_allclose(np.asarray(out), np.asarray(ref), atol=2e-2, rtol=2e-2)

    print("KERNEL_OK")
</pallas_src>

<mosaic_0001>
module attributes {stable_mosaic.version = 11 : i64} {
  func.func private @main(%arg0: i32) attributes {dimension_semantics = [#tpu.dimension_semantics<core_parallel>], iteration_bounds = array<i64: 2>, tpu.core_type = #tpu.core_type<sc_scalar_subcore>, window_params = []} {
    return
  }
}

module attributes {stable_mosaic.version = 11 : i64} {
  func.func private @main(%arg0: i32) attributes {dimension_semantics = [#tpu.dimension_semantics<core_parallel>], iteration_bounds = array<i64: 2>, tpu.core_type = #tpu.core_type<sc_scalar_subcore>, window_params = []} {
    return
  }
}

module attributes {stable_mosaic.version = 11 : i64} {
  func.func @_gat_block_kernel(%arg0: i32, %arg1: memref<8x3xf32, #tpu.memory_space<vmem>>, %arg2: memref<16x32xf32, #tpu.memory_space<vmem>>, %arg3: memref<8x32xf32, #tpu.memory_space<vmem>>, %arg4: memref<64x8xf32, #tpu.memory_space<vmem>>, %arg5: memref<64x3xf32, #tpu.memory_space<vmem>>, %arg6: memref<64x16xf32, #tpu.memory_space<vmem>>, %arg7: memref<8x64xf32, #tpu.memory_space<vmem>>, %arg8: memref<8x16xf32, #tpu.memory_space<vmem>>, %arg9: memref<32x96xf32, #tpu.memory_space<vmem>>, %arg10: memref<32x96xf32, #tpu.memory_space<vmem>>, %arg11: memref<8x96xf32, #tpu.memory_space<vmem>>, %arg12: memref<32x3xf32, #tpu.memory_space<vmem>>, %arg13: memref<32x3xf32, #tpu.memory_space<vmem>>, %arg14: memref<96x3xf32, #tpu.memory_space<vmem>>, %arg15: memref<1x96xf32, #tpu.memory_space<vmem>>, %arg16: memref<8x32xf32, #tpu.memory_space<vmem>>) attributes {dimension_semantics = [#tpu.dimension_semantics<parallel>], iteration_bounds = array<i64: 2>, scalar_prefetch = 0 : i64, scratch_operands = 0 : i64, tpu.core_type = #tpu.core_type<tc>, window_params = [{transform_indices = @transform_0, window_bounds = array<i64: 8, 3>}, {pipeline_mode = #tpu.pipeline_mode<synchronous>, transform_indices = @transform_1, window_bounds = array<i64: 16, 32>}, {transform_indices = @transform_2, window_bounds = array<i64: 8, 32>}, {pipeline_mode = #tpu.pipeline_mode<synchronous>, transform_indices = @transform_3, window_bounds = array<i64: 64, 8>}, {pipeline_mode = #tpu.pipeline_mode<synchronous>, transform_indices = @transform_4, window_bounds = array<i64: 64, 3>}, {pipeline_mode = #tpu.pipeline_mode<synchronous>, transform_indices = @transform_5, window_bounds = array<i64: 64, 16>}, {transform_indices = @transform_6, window_bounds = array<i64: 8, 64>}, {transform_indices = @transform_7, window_bounds = array<i64: 8, 16>}, {pipeline_mode = #tpu.pipeline_mode<synchronous>, transform_indices = @transform_8, window_bounds = array<i64: 32, 96>}, {pipeline_mode = #tpu.pipeline_mode<synchronous>, transform_indices = @transform_9, window_bounds = array<i64: 32, 96>}, {pipeline_mode = #tpu.pipeline_mode<synchronous>, transform_indices = @transform_10, window_bounds = array<i64: 8, 96>}, {pipeline_mode = #tpu.pipeline_mode<synchronous>, transform_indices = @transform_11, window_bounds = array<i64: 32, 3>}, {pipeline_mode = #tpu.pipeline_mode<synchronous>, transform_indices = @transform_12, window_bounds = array<i64: 32, 3>}, {pipeline_mode = #tpu.pipeline_mode<synchronous>, transform_indices = @transform_13, window_bounds = array<i64: 96, 3>}, {pipeline_mode = #tpu.pipeline_mode<synchronous>, transform_indices = @transform_14, window_bounds = array<i64: 1, 96>}, {transform_indices = @transform_15, window_bounds = array<i64: 8, 32>}]} {
    %c0 = arith.constant 0 : index
    %c0_0 = arith.constant 0 : index
    %0 = vector.load %arg2[%c0, %c0_0] : memref<16x32xf32, #tpu.memory_space<vmem>>, vector<16x32xf32>
    %c0_1 = arith.constant 0 : index
    %c0_2 = arith.constant 0 : index
    %1 = vector.load %arg9[%c0_1, %c0_2] : memref<32x96xf32, #tpu.memory_space<vmem>>, vector<32x96xf32>
    %cst = arith.constant dense<0.000000e+00> : vector<16x96xf32>
    %2 = tpu.matmul %0, %1, %cst {dimension_numbers = #tpu.dot_dimension_numbers<[1], [0], [0], [1], [0, 0, 1, 1], [], []>} : vector<16x32xf32>, vector<32x96xf32>, vector<16x96xf32> -> vector<16x96xf32>
    %c0_3 = arith.constant 0 : index
    %c0_4 = arith.constant 0 : index
    %3 = vector.load %arg2[%c0_3, %c0_4] : memref<16x32xf32, #tpu.memory_space<vmem>>, vector<16x32xf32>
    %c0_5 = arith.constant 0 : index
    %c0_6 = arith.constant 0 : index
    %4 = vector.load %arg12[%c0_5, %c0_6] : memref<32x3xf32, #tpu.memory_space<vmem>>, vector<32x3xf32>
    %cst_7 = arith.constant dense<0.000000e+00> : vector<16x3xf32>
    %5 = tpu.matmul %3, %4, %cst_7 {dimension_numbers = #tpu.dot_dimension_numbers<[1], [0], [0], [1], [0, 0, 1, 1], [], []>} : vector<16x32xf32>, vector<32x3xf32>, vector<16x3xf32> -> vector<16x3xf32>
    %c0_8 = arith.constant 0 : index
    %c0_9 = arith.constant 0 : index
    %6 = vector.load %arg4[%c0_8, %c0_9] : memref<64x8xf32, #tpu.memory_space<vmem>>, vector<64x8xf32>
    %c0_10 = arith.constant 0 : index
    %c0_11 = arith.constant 0 : index
    %7 = vector.load %arg11[%c0_10, %c0_11] : memref<8x96xf32, #tpu.memory_space<vmem>>, vector<8x96xf32>
    %cst_12 = arith.constant dense<0.000000e+00> : vector<64x96xf32>
    %8 = tpu.matmul %6, %7, %cst_12 {dimension_numbers = #tpu.dot_dimension_numbers<[1], [0], [0], [1], [0, 0, 1, 1], [], []>} : vector<64x8xf32>, vector<8x96xf32>, vector<64x96xf32> -> vector<64x96xf32>
    %c0_13 = arith.constant 0 : index
    %c0_14 = arith.constant 0 : index
    %9 = vector.load %arg14[%c0_13, %c0_14] : memref<96x3xf32, #tpu.memory_space<vmem>>, vector<96x3xf32>
    %cst_15 = arith.constant dense<0.000000e+00> : vector<64x3xf32>
    %10 = tpu.matmul %8, %9, %cst_15 {dimension_numbers = #tpu.dot_dimension_numbers<[1], [0], [0], [1], [0, 0, 1, 1], [], []>} : vector<64x96xf32>, vector<96x3xf32>, vector<64x3xf32> -> vector<64x3xf32>
    %c0_16 = arith.constant 0 : index
    %c0_17 = arith.constant 0 : index
    %11 = vector.load %arg5[%c0_16, %c0_17] : memref<64x3xf32, #tpu.memory_space<vmem>>, vector<64x3xf32>
    %c0_18 = arith.constant 0 : index
    %c0_19 = arith.constant 0 : index
    %12 = vector.load %arg6[%c0_18, %c0_19] : memref<64x16xf32, #tpu.memory_space<vmem>>, vector<64x16xf32>
    %cst_20 = arith.constant dense<0.000000e+00> : vector<64x3xf32>
    %13 = tpu.matmul %12, %5, %cst_20 {dimension_numbers = #tpu.dot_dimension_numbers<[1], [0], [0], [1], [0, 0, 1, 1], [], []>} : vector<64x16xf32>, vector<16x3xf32>, vector<64x3xf32> -> vector<64x3xf32>
    %14 = arith.mulf %13, %11 : vector<64x3xf32>
    %cst_21 = arith.constant dense<0.000000e+00> : vector<64xf32>
    %15 = vector.multi_reduction <add>, %14, %cst_21 [1] : vector<64x3xf32> to vector<64xf32>
    %16 = vector.shape_cast %15 : vector<64xf32> to vector<64x1xf32>
    %17 = arith.mulf %10, %11 : vector<64x3xf32>
    %cst_22 = arith.constant dense<0.000000e+00> : vector<64xf32>
    %18 = vector.multi_reduction <add>, %17, %cst_22 [1] : vector<64x3xf32> to vector<64xf32>
    %19 = vector.shape_cast %18 : vector<64xf32> to vector<64x1xf32>
    %c0_23 = arith.constant 0 : index
    %c0_24 = arith.constant 0 : index
    %20 = vector.load %arg1[%c0_23, %c0_24] : memref<8x3xf32, #tpu.memory_space<vmem>>, vector<8x3xf32>
    %c0_25 = arith.constant 0 : index
    %c0_26 = arith.constant 0 : index
    %21 = vector.load %arg3[%c0_25, %c0_26] : memref<8x32xf32, #tpu.memory_space<vmem>>, vector<8x32xf32>
    %c0_27 = arith.constant 0 : index
    %c0_28 = arith.constant 0 : index
    %22 = vector.load %arg13[%c0_27, %c0_28] : memref<32x3xf32, #tpu.memory_space<vmem>>, vector<32x3xf32>
    %cst_29 = arith.constant dense<0.000000e+00> : vector<8x3xf32>
    %23 = tpu.matmul %21, %22, %cst_29 {dimension_numbers = #tpu.dot_dimension_numbers<[1], [0], [0], [1], [0, 0, 1, 1], [], []>} : vector<8x32xf32>, vector<32x3xf32>, vector<8x3xf32> -> vector<8x3xf32>
    %24 = arith.mulf %23, %20 : vector<8x3xf32>
    %cst_30 = arith.constant dense<0.000000e+00> : vector<8xf32>
    %25 = vector.multi_reduction <add>, %24, %cst_30 [1] : vector<8x3xf32> to vector<8xf32>
    %26 = vector.shape_cast %25 : vector<8xf32> to vector<8x1xf32>
    %c0_31 = arith.constant 0 : index
    %c0_32 = arith.constant 0 : index
    %27 = vector.load %arg7[%c0_31, %c0_32] : memref<8x64xf32, #tpu.memory_space<vmem>>, vector<8x64xf32>
    %cst_33 = arith.constant dense<0.000000e+00> : vector<64x1xf32>
    %28 = tpu.matmul %27, %26, %cst_33 {dimension_numbers = #tpu.dot_dimension_numbers<[0], [0], [1], [1], [0, 1, 1, 1], [], []>} : vector<8x64xf32>, vector<8x1xf32>, vector<64x1xf32> -> vector<64x1xf32>
    %29 = arith.addf %16, %19 : vector<64x1xf32>
    %30 = arith.addf %29, %28 : vector<64x1xf32>
    %cst_34 = arith.constant 0.000000e+00 : f32
    %31 = vector.broadcast %cst_34 : f32 to vector<64x1xf32>
    %32 = arith.cmpf ogt, %30, %31 : vector<64x1xf32>
    %cst_35 = arith.constant 2.000000e-01 : f32
    %33 = vector.broadcast %cst_35 : f32 to vector<64x1xf32>
    %34 = arith.mulf %33, %30 : vector<64x1xf32>
    %35 = arith.select %32, %30, %34 : vector<64x1xi1>, vector<64x1xf32>
    %c0_36 = arith.constant 0 : index
    %c0_37 = arith.constant 0 : index
    %36 = vector.load %arg7[%c0_36, %c0_37] : memref<8x64xf32, #tpu.memory_space<vmem>>, vector<8x64xf32>
    %c0_38 = arith.constant 0 : index
    %c0_39 = arith.constant 0 : index
    %37 = vector.load %arg6[%c0_38, %c0_39] : memref<64x16xf32, #tpu.memory_space<vmem>>, vector<64x16xf32>
    %38 = vector.broadcast %35 : vector<64x1xf32> to vector<64x16xf32>
    %39 = arith.mulf %38, %37 : vector<64x16xf32>
    %cst_40 = arith.constant dense<0.000000e+00> : vector<8x16xf32>
    %40 = tpu.matmul %36, %39, %cst_40 {dimension_numbers = #tpu.dot_dimension_numbers<[1], [0], [0], [1], [0, 0, 1, 1], [], []>} : vector<8x64xf32>, vector<64x16xf32>, vector<8x16xf32> -> vector<8x16xf32>
    %c0_41 = arith.constant 0 : index
    %c0_42 = arith.constant 0 : index
    %41 = vector.load %arg8[%c0_41, %c0_42] : memref<8x16xf32, #tpu.memory_space<vmem>>, vector<8x16xf32>
    %cst_43 = arith.constant 5.000000e-01 : f32
    %42 = vector.broadcast %cst_43 : f32 to vector<8x16xf32>
    %43 = arith.cmpf ogt, %41, %42 : vector<8x16xf32>
    %cst_44 = arith.constant -1.000000e+30 : f32
    %44 = vector.broadcast %cst_44 : f32 to vector<8x16xf32>
    %45 = arith.select %43, %40, %44 : vector<8x16xi1>, vector<8x16xf32>
    %cst_45 = arith.constant dense<0xFF800000> : vector<8xf32>
    %46 = vector.multi_reduction <maximumf>, %45, %cst_45 [1] : vector<8x16xf32> to vector<8xf32>
    %47 = vector.shape_cast %46 : vector<8xf32> to vector<8x1xf32>
    %48 = vector.broadcast %47 : vector<8x1xf32> to vector<8x16xf32>
    %49 = arith.subf %45, %48 : vector<8x16xf32>
    %50 = math.exp %49 : vector<8x16xf32>
    %cst_46 = arith.constant dense<0.000000e+00> : vector<8xf32>
    %51 = vector.multi_reduction <add>, %50, %cst_46 [1] : vector<8x16xf32> to vector<8xf32>
    %52 = vector.shape_cast %51 : vector<8xf32> to vector<8x1xf32>
    %cst_47 = arith.constant 1.000000e+00 : f32
    %53 = vector.broadcast %cst_47 : f32 to vector<8x1xf32>
    %54 = arith.divf %53, %52 : vector<8x1xf32>
    %55 = vector.broadcast %54 : vector<8x1xf32> to vector<8x16xf32>
    %56 = arith.mulf %50, %55 : vector<8x16xf32>
    %cst_48 = arith.constant dense<0.000000e+00> : vector<8x96xf32>
    %57 = tpu.matmul %56, %2, %cst_48 {dimension_numbers = #tpu.dot_dimension_numbers<[1], [0], [0], [1], [0, 0, 1, 1], [], []>} : vector<8x16xf32>, vector<16x96xf32>, vector<8x96xf32> -> vector<8x96xf32>
    %c0_49 = arith.constant 0 : index
    %c0_50 = arith.constant 0 : index
    %58 = vector.load %arg3[%c0_49, %c0_50] : memref<8x32xf32, #tpu.memory_space<vmem>>, vector<8x32xf32>
    %c0_51 = arith.constant 0 : index
    %c0_52 = arith.constant 0 : index
    %59 = vector.load %arg10[%c0_51, %c0_52] : memref<32x96xf32, #tpu.memory_space<vmem>>, vector<32x96xf32>
    %cst_53 = arith.constant dense<0.000000e+00> : vector<8x96xf32>
    %60 = tpu.matmul %58, %59, %cst_53 {dimension_numbers = #tpu.dot_dimension_numbers<[1], [0], [0], [1], [0, 0, 1, 1], [], []>} : vector<8x32xf32>, vector<32x96xf32>, vector<8x96xf32> -> vector<8x96xf32>
    %61 = arith.addf %57, %60 : vector<8x96xf32>
    %c0_54 = arith.constant 0 : index
    %c0_55 = arith.constant 0 : index
    %62 = vector.load %arg15[%c0_54, %c0_55] : memref<1x96xf32, #tpu.memory_space<vmem>>, vector<1x96xf32>
    %63 = vector.broadcast %62 : vector<1x96xf32> to vector<8x96xf32>
    %64 = arith.addf %61, %63 : vector<8x96xf32>
    %cst_56 = arith.constant 0.000000e+00 : f32
    %65 = vector.broadcast %cst_56 : f32 to vector<8x32xf32>
    %66 = vector.extract_strided_slice %20 {offsets = [0, 0], sizes = [8, 1], strides = [1, 1]} : vector<8x3xf32> to vector<8x1xf32>
    %67 = vector.extract_strided_slice %64 {offsets = [0, 0], sizes = [8, 32], strides = [1, 1]} : vector<8x96xf32> to vector<8x32xf32>
    %68 = vector.broadcast %66 : vector<8x1xf32> to vector<8x32xf32>
    %69 = arith.mulf %68, %67 : vector<8x32xf32>
    %70 = arith.addf %65, %69 : vector<8x32xf32>
    %71 = vector.extract_strided_slice %20 {offsets = [0, 1], sizes = [8, 1], strides = [1, 1]} : vector<8x3xf32> to vector<8x1xf32>
    %72 = vector.extract_strided_slice %64 {offsets = [0, 32], sizes = [8, 32], strides = [1, 1]} : vector<8x96xf32> to vector<8x32xf32>
    %73 = vector.broadcast %71 : vector<8x1xf32> to vector<8x32xf32>
    %74 = arith.mulf %73, %72 : vector<8x32xf32>
    %75 = arith.addf %70, %74 : vector<8x32xf32>
    %76 = vector.extract_strided_slice %20 {offsets = [0, 2], sizes = [8, 1], strides = [1, 1]} : vector<8x3xf32> to vector<8x1xf32>
    %77 = vector.extract_strided_slice %64 {offsets = [0, 64], sizes = [8, 32], strides = [1, 1]} : vector<8x96xf32> to vector<8x32xf32>
    %78 = vector.broadcast %76 : vector<8x1xf32> to vector<8x32xf32>
    %79 = arith.mulf %78, %77 : vector<8x32xf32>
    %80 = arith.addf %75, %79 : vector<8x32xf32>
    %cst_57 = arith.constant 0.000000e+00 : f32
    %81 = vector.broadcast %cst_57 : f32 to vector<8x32xf32>
    %82 = arith.maximumf %80, %81 : vector<8x32xf32>
    %c0_58 = arith.constant 0 : index
    %c0_59 = arith.constant 0 : index
    %83 = vector.load %arg16[%c0_58, %c0_59] : memref<8x32xf32, #tpu.memory_space<vmem>>, vector<8x32xf32>
    tpu.vector_store %arg16[%c0_58, %c0_59], %82 {strides = array<i32>} : memref<8x32xf32, #tpu.memory_space<vmem>>, vector<8x32xf32>,
    return
  }
  func.func @transform_0(%arg0: i32) -> (i32, i32) {
    %c0_i32 = arith.constant 0 : i32
    %c0_i32_0 = arith.constant 0 : i32
    return %arg0, %c0_i32 : i32, i32
  }
  func.func @transform_1(%arg0: i32) -> (i32, i32) {
    %c0_i32 = arith.constant 0 : i32
    %c0_i32_0 = arith.constant 0 : i32
    %c0_i32_1 = arith.constant 0 : i32
    return %c0_i32, %c0_i32_0 : i32, i32
  }
  func.func @transform_2(%arg0: i32) -> (i32, i32) {
    %c0_i32 = arith.constant 0 : i32
    %c0_i32_0 = arith.constant 0 : i32
    return %arg0, %c0_i32 : i32, i32
  }
  func.func @transform_3(%arg0: i32) -> (i32, i32) {
    %c0_i32 = arith.constant 0 : i32
    %c0_i32_0 = arith.constant 0 : i32
    %c0_i32_1 = arith.constant 0 : i32
    return %c0_i32, %c0_i32_0 : i32, i32
  }
  func.func @transform_4(%arg0: i32) -> (i32, i32) {
    %c0_i32 = arith.constant 0 : i32
    %c0_i32_0 = arith.constant 0 : i32
    %c0_i32_1 = arith.constant 0 : i32
    return %c0_i32, %c0_i32_0 : i32, i32
  }
  func.func @transform_5(%arg0: i32) -> (i32, i32) {
    %c0_i32 = arith.constant 0 : i32
    %c0_i32_0 = arith.constant 0 : i32
    %c0_i32_1 = arith.constant 0 : i32
    return %c0_i32, %c0_i32_0 : i32, i32
  }
  func.func @transform_6(%arg0: i32) -> (i32, i32) {
    %c0_i32 = arith.constant 0 : i32
    %c0_i32_0 = arith.constant 0 : i32
    return %arg0, %c0_i32 : i32, i32
  }
  func.func @transform_7(%arg0: i32) -> (i32, i32) {
    %c0_i32 = arith.constant 0 : i32
    %c0_i32_0 = arith.constant 0 : i32
    return %arg0, %c0_i32 : i32, i32
  }
  func.func @transform_8(%arg0: i32) -> (i32, i32) {
    %c0_i32 = arith.constant 0 : i32
    %c0_i32_0 = arith.constant 0 : i32
    %c0_i32_1 = arith.constant 0 : i32
    return %c0_i32, %c0_i32_0 : i32, i32
  }
  func.func @transform_9(%arg0: i32) -> (i32, i32) {
    %c0_i32 = arith.constant 0 : i32
    %c0_i32_0 = arith.constant 0 : i32
    %c0_i32_1 = arith.constant 0 : i32
    return %c0_i32, %c0_i32_0 : i32, i32
  }
  func.func @transform_10(%arg0: i32) -> (i32, i32) {
    %c0_i32 = arith.constant 0 : i32
    %c0_i32_0 = arith.constant 0 : i32
    %c0_i32_1 = arith.constant 0 : i32
    return %c0_i32, %c0_i32_0 : i32, i32
  }
  func.func @transform_11(%arg0: i32) -> (i32, i32) {
    %c0_i32 = arith.constant 0 : i32
    %c0_i32_0 = arith.constant 0 : i32
    %c0_i32_1 = arith.constant 0 : i32
    return %c0_i32, %c0_i32_0 : i32, i32
  }
  func.func @transform_12(%arg0: i32) -> (i32, i32) {
    %c0_i32 = arith.constant 0 : i32
    %c0_i32_0 = arith.constant 0 : i32
    %c0_i32_1 = arith.constant 0 : i32
    return %c0_i32, %c0_i32_0 : i32, i32
  }
  func.func @transform_13(%arg0: i32) -> (i32, i32) {
    %c0_i32 = arith.constant 0 : i32
    %c0_i32_0 = arith.constant 0 : i32
    %c0_i32_1 = arith.constant 0 : i32
    return %c0_i32, %c0_i32_0 : i32, i32
  }
  func.func @transform_14(%arg0: i32) -> (i32, i32) {
    %c0_i32 = arith.constant 0 : i32
    %c0_i32_0 = arith.constant 0 : i32
    %c0_i32_1 = arith.constant 0 : i32
    return %c0_i32, %c0_i32_0 : i32, i32
  }
  func.func @transform_15(%arg0: i32) -> (i32, i32) {
    %c0_i32 = arith.constant 0 : i32
    %c0_i32_0 = arith.constant 0 : i32
    return %arg0, %c0_i32 : i32, i32
  }
}

</mosaic_0001>

<bundles_post_ra>
// kernel: cnf_processing_block.1
= control target key start
LH: loop header
LB: loop body
LE: loop exit
PB: predicated region body
PF: predicated region fallthrough
CT: control target
= control target key end

     0   :  { %s2897_s0 = inlined_call_operand.vmem [shape: f32[16,3], index: 0, kind: input, shape index: {}]   ;;  %s2898_s1 = inlined_call_operand.vmem [shape: f32[16,32], index: 1, kind: input, shape index: {}, may-alias: {1,2}]   ;;  %s2899_s2 = inlined_call_operand.vmem [shape: f32[16,32], index: 2, kind: input, shape index: {}, may-alias: {1,2}]   ;;  %s2900_s3 = inlined_call_operand.vmem [shape: f32[64,8], index: 3, kind: input, shape index: {}]   ;;  %s2901_s4 = inlined_call_operand.vmem [shape: f32[64,3], index: 4, kind: input, shape index: {}]   ;;  %s2902_s5 = inlined_call_operand.vmem [shape: f32[64,16], index: 5, kind: input, shape index: {}]   ;;  %s2903_s6 = inlined_call_operand.vmem [shape: f32[16,64], index: 6, kind: input, shape index: {}]   ;;  %s2904_s7 = inlined_call_operand.vmem [shape: f32[16,16], index: 7, kind: input, shape index: {}]   ;;  %s2905_s8 = inlined_call_operand.vmem [shape: f32[32,96], index: 8, kind: input, shape index: {}]   ;;  %s2906_s9 = inlined_call_operand.vmem [shape: f32[32,96], index: 9, kind: input, shape index: {}]   ;;  %s2907_s10 = inlined_call_operand.vmem [shape: f32[8,96], index: 10, kind: input, shape index: {}]   ;;  %s2908_s11 = inlined_call_operand.vmem [shape: f32[32,3], index: 11, kind: input, shape index: {}]   ;;  %s2909_s12 = inlined_call_operand.vmem [shape: f32[32,3], index: 12, kind: input, shape index: {}]   ;;  %s2910_s13 = inlined_call_operand.vmem [shape: f32[96,3], index: 13, kind: input, shape index: {}]   ;;  %s2911_s14 = inlined_call_operand.vmem [shape: f32[1,96], index: 14, kind: input, shape index: {}]   ;;  %s2912_s15 = inlined_call_operand.hbm [shape: f32[16,32], index: 15, kind: output, shape index: {}]  }
   0x1   :  { %2917 = sst [smem:[#allocation9_spill]] %s2897_s0 }
   0x2   :  { %20 = vsyncpa [#allocation3], 0 }
   0x3   :  { %22 = vsyncpa [#allocation3 + $0x1], 0  ;;  %s2481_s18 = smov 0   ;;  %s2483_s19 = smov 0  }
   0x4   :  { %s2485_s20 = smov 0   ;;  %s2487_s21 = smov 0  }
   0x5 LB: > { %2918 = sst [smem:[#allocation5_spill]] %s2386_s20  ;;  %s2502_s22 = sadd.s32 4294967295, %s2390_s21   ;;  %s2390_s21 = sphi %s2487_s21, %s2926_s21   ;;  %s2386_s20 = sphi %s2485_s20, %s2928_s20   ;;  %s2382_s19 = sphi %s2483_s19, %s2930_s19   ;;  %s2378_s18 = sphi %s2481_s18, %s2929_s18  }
   0x6   : > { %s1915_s23 = sadd.s32 4294967294, %s2390_s21   ;;  %s2506_s24 = sadd.s32 1, %s2390_s21  }
   0x7   : > { %2919 = sst [smem:[#allocation6_spill]] %s2506_s24  ;;  %s370_s25 = sadd.s32 1, %s2386_s20 }
   0x8   : > { %s367_s26 = ssub.s32 %s2390_s21, %s2506_s24  ;;  %p380_p0 = scmp.ne.s32.totalorder %s2386_s20, %s2382_s19 }
   0x9   : > { %p368_p1 = scmp.eq.s32.totalorder %s367_s26, 0  ;;  %p381_p2 = scmp.eq.s32.totalorder %s2502_s22, 1 }
   0xa   : > { %p386_p3 = scmp.ne.s32.totalorder %s2382_s19, %s2378_s18  ;;  %p387_p4 = scmp.eq.s32.totalorder %s1915_s23, 1 }
   0xb   : > { %s2517_s27 = scalar_select %p368_p1, %s2386_s20, %s370_s25  }
   0xc   : > { %p2519_p5 = por %p381_p2, %p380_p0  ;;  %p2523_p6 = por %p387_p4, %p386_p3 }
   0xd   : > { %2920 = sst [smem:[#allocation7_spill]] %s2517_s27  ;;  %p1918_p7 = scmp.ge.s32.totalorder %s2390_s21, 1 }
   0xe   : > { %s2922_s29 = scalar_select %p2523_p6, 1, 0 }
   0xf   : > { %p466_p8 = scmp.lt.s32.totalorder %s2390_s21, 3 }
  0x10   : > { %2923 = sst [smem:[#allocation8_spill]] %s2922_s29 }
  0x11   : > { %p467_p9 = pnand %p1918_p7, %p466_p8 }
  0x12   : > { %v629_v0 = vld [vmem:[%s2908_s11] sm:$0xff] (!%p467_p9)  ;;  %v630_v1 = vld [vmem:[%s2908_s11 + $0x8] sm:$0xff] (!%p467_p9)  ;;  %v631_v2 = vld [vmem:[%s2908_s11 + $0x10] sm:$0xff] (!%p467_p9)  ;;  %vm547_vm0 = vcmask (!%p467_p9), 261120   ;;  %vm717_vm1 = vcmask (!%p467_p9), 64512   ;;  %vm1005_vm2 = vcmask (!%p467_p9), 130048  }
  0x13   : > { %470 = sbr.rel (%p467_p9) target bundleno = 1920 (0x780), region = 80  ;;  %v2209_v3 = vpack.c.bf16 (!%p467_p9), %v630_v1, %v629_v0  ;;  %v632_v4 = vld [vmem:[%s2908_s11 + $0x18] sm:$0xff] (!%p467_p9)  ;;  %v541_v5 = vld [vmem:[%s2898_s1] sm:$0xff] (!%p467_p9)  ;;  %v544_v8 = vld [vmem:[%s2905_s8 + $0x8] sm:$0xff] (!%p467_p9)  ;;  %v2392_v42 = vmov (!%p467_p9), 0.0|0.0   ;;  %vm859_vm3 = vcmask (!%p467_p9), 785408  }
  0x14   : > { %v2213_v6 = vpack.c.bf16 (!%p467_p9), %v632_v4, %v631_v2  ;;  %2070 = vmatprep.mubr.msk.f32.mxu1 (!%p467_p9), %vm547_vm0, %v541_v5  ;;  %v543_v7 = vld [vmem:[%s2905_s8] sm:$0xff] (!%p467_p9)  ;;  %v545_v9 = vld [vmem:[%s2905_s8 + $0x10] sm:$0xff] (!%p467_p9)  ;;  %2059 = vmatprep.mubr.msk.f32.mxu0 (!%p467_p9), %vm547_vm0, %v541_v5  ;;  %v546_v11 = vld [vmem:[%s2905_s8 + $0x18] sm:$0xff] (!%p467_p9)  ;;  %p525_p10 = scmp.lt.s32.totalorder (!%p467_p9), %s2502_s22, 1  ;;  %vm2393_vm4 = vmmov (!%p467_p9), 0   ;;  %vm1143_vm5 = vcmask (!%p467_p9), 23552  }
  0x15   : > { %2210 = vmatprep.subr.bf16.mxu1 (!%p467_p9), %v2209_v3  ;;  %v2201_v10 = vpack.c.bf16 (!%p467_p9), %v544_v8, %v543_v7  ;;  %v2205_v12 = vpack.c.bf16 (!%p467_p9), %v546_v11, %v545_v9  ;;  %v847_v13 = vld [vmem:[%s2910_s13] sm:$0xff] (!%p467_p9)  ;;  %v848_v14 = vld [vmem:[%s2910_s13 + $0x8] sm:$0xff] (!%p467_p9)  ;;  %v849_v16 = vld [vmem:[%s2910_s13 + $0x10] sm:$0xff] (!%p467_p9)  ;;  %s2924_s0 = sld [smem:[#allocation9_spill]] (!%p467_p9)  ;;  %vm1533_vm14 = vcmask (!%p467_p9), 523264   ;;  %s2398_s29 = smov (!%p467_p9), 96  }
  0x16   : > { %2212 = vmatpush3.bf16.msra.mxu1 (!%p467_p9), %v2209_v3  ;;  %v2217_v15 = vpack.c.bf16 (!%p467_p9), %v848_v14, %v847_v13  ;;  %v850_v17 = vld [vmem:[%s2910_s13 + $0x18] sm:$0xff] (!%p467_p9)  ;;  %v542_v18 = vld [vmem:[%s2898_s1 + $0x8] sm:$0xff] (!%p467_p9)  ;;  %v716_v19 = vld [vmem:[%s2907_s10] sm:$0xff] (!%p467_p9)  ;;  %s522_s16 = sand.u32 (!%p467_p9), 1, %s2382_s19   ;;  %s1966_s23 = sshll.u32 (!%p467_p9), %s2502_s22, 7 }
  0x17   : > { %2214 = vmatprep.subr.bf16.mxu1 (!%p467_p9), %v2213_v6  ;;  %2202 = vmatprep.subr.bf16.mxu0 (!%p467_p9), %v2201_v10  ;;  %v2221_v20 = vpack.c.bf16 (!%p467_p9), %v850_v17, %v849_v16  ;;  %v708_v21 = vld [vmem:[%s2900_s3] sm:$0xff] (!%p467_p9)  ;;  %v709_v22 = vld [vmem:[%s2900_s3 + $0x8] sm:$0xff] (!%p467_p9)  ;;  %v710_v23 = vld [vmem:[%s2900_s3 + $0x10] sm:$0xff] (!%p467_p9)  ;;  %s1919_s17 = sshll.u32 (!%p467_p9), %s522_s16, 3  ;;  %s2854_s27 = scalar_lea.hbm (!%p467_p9), %s2912_s15, %s1966_s23 }
  0x18   : > { %2204 = vmatpush3.bf16.msra.mxu0 (!%p467_p9), %v2201_v10  ;;  %v711_v24 = vld [vmem:[%s2900_s3 + $0x18] sm:$0xff] (!%p467_p9)  ;;  %v712_v25 = vld [vmem:[%s2900_s3 + $0x20] sm:$0xff] (!%p467_p9)  ;;  %v713_v26 = vld [vmem:[%s2900_s3 + $0x28] sm:$0xff] (!%p467_p9) }
  0x19   : > { %2206 = vmatprep.subr.bf16.mxu0 (!%p467_p9), %v2205_v12  ;;  %v714_v27 = vld [vmem:[%s2900_s3 + $0x30] sm:$0xff] (!%p467_p9)  ;;  %v715_v28 = vld [vmem:[%s2900_s3 + $0x38] sm:$0xff] (!%p467_p9)  ;;  %v851_v29 = vld [vmem:[%s2910_s13 + $0x20] sm:$0xff] (!%p467_p9) }
  0x1a   : > { %2216 = vmatpush3.bf16.msra.mxu1 %v2213_v6  ;;  %v852_v30 = vld [vmem:[%s2910_s13 + $0x28] sm:$0xff]  ;;  %v853_v32 = vld [vmem:[%s2910_s13 + $0x30] sm:$0xff]  ;;  %v854_v33 = vld [vmem:[%s2910_s13 + $0x38] sm:$0xff]  ;;  %s526_s30 = scalar_select %p525_p10, %s2502_s22, 1  ;;  %v2394_v6 = vmov 0.0  }
  0x1b   : > { %2218 = vmatprep.subr.bf16.mxu1 %v2217_v15  ;;  %v2225_v31 = vpack.c.bf16 %v852_v30, %v851_v29  ;;  %v2229_v34 = vpack.c.bf16 %v854_v33, %v853_v32  ;;  %v2625_v35 = vld [vmem:[%s2902_s5] sm:$0xff]  ;;  %v856_v37 = vld [vmem:[%s2910_s13 + $0x48] sm:$0xff]  ;;  %v857_v39 = vld [vmem:[%s2910_s13 + $0x50] sm:$0xff]  ;;  %s2400_s22 = smov [#allocation2]  }
  0x1c   : > { %2208 = vmatpush3.bf16.msra.mxu0 %v2205_v12  ;;  %v855_v36 = vld [vmem:[%s2910_s13 + $0x40] sm:$0xff]  ;;  %v858_v40 = vld [vmem:[%s2910_s13 + $0x58] sm:$0xff]  ;;  %v1203_v49 = vld [vmem:[%s2909_s12 + $0x8] sm:$0xff]  ;;  %s2706_s26 = sshll.u32 %s526_s30, 3 }
  0x1d   : > { %2071 = vmatmul.mubr.msk.f32.vlgmr.msra.gmra.mrb[0].mxu1 %vm547_vm0, %v542_v18  ;;  %2073 = vmatprep.subr.mxu0 %v716_v19  ;;  %v2233_v38 = vpack.c.bf16 %v856_v37, %v855_v36  ;;  %v2237_v41 = vpack.c.bf16 %v858_v40, %v857_v39  ;;  %v1202_v48 = vld [vmem:[%s2909_s12] sm:$0xff]  ;;  %v2657_v51 = vld [vmem:[%s2902_s5 + $0x8] sm:$0xff]  ;;  %v2662_v52 = vld [vmem:[%s2902_s5 + $0x10] sm:$0xff]  ;;  %s532_s30 = scalar_lea.vmem %s2899_s2, %s2706_s26  ;;  %s536_s25 = scalar_lea.vmem %s2903_s6, %s2706_s26 }
  0x1e   : > { %2220 = vmatpush3.bf16.msra.mxu1 %v2217_v15  ;;  %v2246_v54 = vpack.c.bf16 %v1203_v49, %v1202_v48  ;;  %v1204_v56 = vld [vmem:[%s2909_s12 + $0x10] sm:$0xff]  ;;  %v1205_v57 = vld [vmem:[%s2909_s12 + $0x18] sm:$0xff]  ;;  %v2686_v59 = vld [vmem:[%s2902_s5 + $0x20] sm:$0xff]  ;;  %s540_s24 = scalar_lea.vmem %s2904_s7, %s2706_s26 }
  0x1f   : > { %2060 = vmatmul.mubr.msk.f32.vlgmr.msra.gmra.mrb[0].mxu0 %vm547_vm0, %v542_v18  ;;  %2222 = vmatprep.subr.bf16.mxu1 %v2221_v20  ;;  %v2680_v58 = vld [vmem:[%s2902_s5 + $0x18] sm:$0xff]  ;;  %v2249_v60 = vpack.c.bf16 %v1205_v57, %v1204_v56  ;;  %v2698_v63 = vld [vmem:[%s2902_s5 + $0x28] sm:$0xff]  ;;  %v2704_v0 = vld [vmem:[%s2902_s5 + $0x30] sm:$0xff] }
  0x20   : > { %2074 = vmatpush3.msra.mxu0 %v716_v19  ;;  %2075 = vmatprep.mubr.msk.f32.mxu0 %vm717_vm1, %v708_v21  ;;  %v2716_v3 = vld [vmem:[%s2902_s5 + $0x38] sm:$0xff]  ;;  %v2728_v7 = vld [vmem:[%s532_s30] sm:$0xff]  ;;  %v990_v10 = vld [vmem:[%s2901_s4 + $0x8] sm:$0xff]  ;;  %s528_s30 = scalar_lea.vmem %s2924_s0, %s2706_s26 }
  0x21   : > { %v989_v8 = vld [vmem:[%s2901_s4] sm:$0xff] }
  0x22   : > { %2224 = vmatpush3.bf16.msra.mxu1 %v2221_v20  ;;  %v2754_v36 = vld [vmem:[%s528_s30] sm:$0xff]  ;;  %s2399_s30 = smov 64  }
  0x23   : > { %2076 = vmatmul.mubr.msk.f32.vlgmr.msra.gmra.mrb[2].mxu0 %vm717_vm1, %v709_v22  ;;  %2226 = vmatprep.subr.bf16.mxu1 %v2225_v31 }
  0x24   : > { %2078 = vmatprep.mubr.msk.f32.mxu0 %vm717_vm1, %v710_v23 }
  0x26   : > { %2228 = vmatpush3.bf16.msra.mxu1 %v2225_v31  ;;  %v991_v31 = vld [vmem:[%s2901_s4 + $0x10] sm:$0xff] }
  0x27   : > { %2079 = vmatmul.mubr.msk.f32.gmra.mrb[4].mxu0 %vm717_vm1, %v711_v24  ;;  %2230 = vmatprep.subr.bf16.mxu1 %v2229_v34 }
  0x28   : > { %2081 = vmatprep.mubr.msk.f32.mxu0 %vm717_vm1, %v712_v25 }
  0x2a   : > { %2232 = vmatpush3.bf16.msra.mxu1 %v2229_v34 }
  0x2b   : > { %2082 = vmatmul.mubr.msk.f32.gmra.mrb[6].mxu0 %vm717_vm1, %v713_v26  ;;  %2234 = vmatprep.subr.bf16.mxu1 %v2233_v38 }
  0x2c   : > { %2084 = vmatprep.mubr.msk.f32.mxu0 %vm717_vm1, %v714_v27 }
  0x2e   : > { %2236 = vmatpush3.bf16.msra.mxu1 %v2233_v38 }
  0x2f   : > { %2085 = vmatmul.mubr.msk.f32.gmra.mrb[8].mxu0 %vm717_vm1, %v715_v28  ;;  %2238 = vmatprep.subr.bf16.mxu1 %v2237_v41  ;;  %v996_v28 = vld [vmem:[%s2901_s4 + $0x38] sm:$0xff] }
  0x30   : > { %2127 = vmatprep.mubr.msk.f32.mxu0 %vm1005_vm2, %v2625_v35 }
  0x32   : > { %2240 = vmatpush3.bf16.msra.mxu1 %v2237_v41 }
  0x33   : > { %2251 = vmatprep.subr.bf16.mxu1 %v2392_v42 }
  0xf0   : > { %v2072_v43 = vpop.f32.mrb[0].mxu1 }
  0xf1   : > { %v699_v44 = vpop.f32.mrb[1].mxu1 }
  0xf2   : > { %v2241_v45 = vpack.c.bf16 %v2072_v43, %v699_v44  ;;  %v2642_v46 = vpop.f32.mrb[0].mxu0  ;;  %v992_v43 = vld [vmem:[%s2901_s4 + $0x18] sm:$0xff] }
  0xf3   : > { %v2644_v47 = vpop.f32.mrb[1].mxu0 }
  0xf4   : > { %2242 = vmatprep.subr.bf16.mxu0 %v2241_v45  ;;  %v2270_v50 = vpack.c.bf16 %v2642_v46, %v2644_v47 }
  0xf5   : > { %2244 = vmatpush3.bf16.msra.mxu0 %v2241_v45 }
  0xf6   : > { %v2077_v53 = vpop.f32.mrb[2].mxu0  ;;  %2245 = vmatprep.subr.bf16.mxu0 %v2392_v42 }
  0xf7   : > { %v808_v55 = vpop.f32.mrb[3].mxu0 }
  0xf8   : > { %2128 = vmatmul.mubr.msk.f32.vlgmr.msra.gmra.mrb[10].mxu0 %vm1005_vm2, %v2657_v51  ;;  %2111 = vmatprep.mubr.msk.f32.mxu1 %vm859_vm3, %v808_v55 }
  0xf9   : > { %2130 = vmatprep.mubr.msk.f32.mxu0 %vm1005_vm2, %v2662_v52  ;;  %2112 = vmatmul.mubr.msk.f32.vlgmr.msra.gmra.mrb[2].mxu1 %vm859_vm3, %v2077_v53 }
  0xfa   : > { %2247 = vmatpush3.bf16.msra.mxu0 %v2246_v54  ;;  %v2080_v61 = vpop.f32.mrb[4].mxu0 }
  0xfb   : > { %2248 = vmatprep.subr.bf16.mxu0 %v2392_v42  ;;  %v818_v62 = vpop.f32.mrb[5].mxu0 }
  0xfc   : > { %2131 = vmatmul.mubr.msk.f32.gmra.mrb[12].mxu0 %vm1005_vm2, %v2680_v58  ;;  %2114 = vmatprep.mubr.msk.f32.mxu1 %vm859_vm3, %v818_v62 }
  0xfd   : > { %2133 = vmatprep.mubr.msk.f32.mxu0 %vm1005_vm2, %v2686_v59  ;;  %2115 = vmatmul.mubr.msk.f32.gmra.mrb[4].mxu1 %vm859_vm3, %v2080_v61 }
  0xfe   : > { %2250 = vmatpush3.bf16.msra.mxu0 %v2249_v60  ;;  %v2083_v1 = vpop.f32.mrb[6].mxu0  ;;  %v993_v60 = vld [vmem:[%s2901_s4 + $0x20] sm:$0xff] }
  0xff   : > { %v828_v2 = vpop.f32.mrb[7].mxu0 }
 0x100   : > { %2134 = vmatmul.mubr.msk.f32.gmra.mrb[14].mxu0 %vm1005_vm2, %v2698_v63  ;;  %2117 = vmatprep.mubr.msk.f32.mxu1 %vm859_vm3, %v828_v2 }
 0x101   : > { %2136 = vmatprep.mubr.msk.f32.mxu0 %vm1005_vm2, %v2704_v0  ;;  %2118 = vmatmul.mubr.msk.f32.gmra.mrb[6].mxu1 %vm859_vm3, %v2083_v1  ;;  %v994_v1 = vld [vmem:[%s2901_s4 + $0x28] sm:$0xff] }
 0x102   : > { %v2086_v4 = vpop.f32.mrb[8].mxu0 }
 0x103   : > { %v838_v5 = vpop.f32.mrb[9].mxu0 }
 0x104   : > { %2137 = vmatmul.mubr.msk.f32.gmra.mrb[16].mxu0 %vm1005_vm2, %v2716_v3  ;;  %2120 = vmatprep.mubr.msk.f32.mxu1 %vm859_vm3, %v838_v5 }
 0x105   : > { %2147 = vmatprep.mubr.msk.f32.mxu0 %vm2393_vm4, %v2394_v6  ;;  %2121 = vmatmul.mubr.msk.f32.gmra.mrb[8].mxu1 %vm859_vm3, %v2086_v4 }
 0x106   : > { %2180 = vmatprep.mubr.msk.f32.mxu1 %vm2393_vm4, %v2394_v6 }
 0x108   : > { %2148 = vmatmul.mubr.msk.f32.vlgmr.msra.gmra.mrb[18].mxu0 %vm547_vm0, %v2728_v7 }
 0x1cb   : > { %v2129_v9 = vpop.f32.mrb[10].mxu0 }
 0x1cc   : > { %v1096_v11 = vpop.f32.mrb[11].mxu0  ;;  %v2113_v12 = vpop.f32.mrb[2].mxu1  ;;  %v1136_v15 = vmul.f32 %v2129_v9, %v990_v10 }
 0x1cd   : > { %v1135_v13 = vmul.f32 %v1096_v11, %v989_v8  ;;  %v950_v14 = vpop.f32.mrb[3].mxu1  ;;  %v1169_v26 = vmul.f32 %v2113_v12, %v990_v10  ;;  %v995_v11 = vld [vmem:[%s2901_s4 + $0x30] sm:$0xff] }
 0x1ce   : > { %v1168_v20 = vmul.f32 %v989_v8, %v950_v14  ;;  %v1147_v22 = vsel %vm1143_vm5, %v1136_v15, 0.0 }
 0x1cf   : > { %v1144_v16 = vsel %vm1143_vm5, %v1135_v13, 0.0  ;;  %v2132_v17 = vpop.f32.mrb[12].mxu0  ;;  %v1179_v37 = vsel %vm1143_vm5, %v1169_v26, 0.0 }
 0x1d0   : > { %1145 = vadd.xlane.f32.xlu1 %v1144_v16  ;;  %v1106_v18 = vpop.f32.mrb[13].mxu0  ;;  %v2116_v19 = vpop.f32.mrb[4].mxu1  ;;  %v1176_v27 = vsel %vm1143_vm5, %v1168_v20, 0.0  ;;  %v1138_v49 = vmul.f32 %v2132_v17, %v992_v43 }
 0x1d1   : > { %v960_v21 = vpop.f32.mrb[5].mxu1  ;;  %v1137_v40 = vmul.f32 %v1106_v18, %v991_v31  ;;  %v1171_v56 = vmul.f32 %v2116_v19, %v992_v43  ;;  %v2787_v19 = vld [vmem:[%s536_s25] sm:$0xff]  ;;  %s524_s25 = scalar_lea.vmem [#allocation2], %s1919_s17  ;;  %s2332_s17 = sshll.u32 %s2400_s22, 4  ;;  %s2333_s17 = int_to_ptr.vmem [resolvable:$false] %s2332_s17 }
 0x1d2   : > { %v1170_v54 = vmul.f32 %v991_v31, %v960_v21  ;;  %v1153_v55 = vsel %vm1143_vm5, %v1138_v49, 0.0  ;;  %s1820_s20 = sshll.u32 %s524_s25, 4  ;;  %s2334_s0 = scalar_lea.vmem %s2333_s17, 256  ;;  %s2856_s20 = int_to_ptr.vmem [resolvable:$true] %s1820_s20 }
 0x1d3   : > { %v2135_v23 = vpop.f32.mrb[14].mxu0  ;;  %v1150_v53 = vsel %vm1143_vm5, %v1137_v40, 0.0  ;;  %v1185_v61 = vsel %vm1143_vm5, %v1171_v56, 0.0  ;;  %p2335_p0 = scmp.lt.s32.totalorder %s2856_s20, %s2333_s17 }
 0x1d4   : > { %1148 = vadd.xlane.f32.xlu1 %v1147_v22  ;;  %v1116_v24 = vpop.f32.mrb[15].mxu0  ;;  %v2119_v25 = vpop.f32.mrb[6].mxu1  ;;  %v1182_v57 = vsel %vm1143_vm5, %v1170_v54, 0.0  ;;  %v1140_v2 = vmul.f32 %v2135_v23, %v994_v1 }
 0x1d5   : > { %v970_v29 = vpop.f32.mrb[7].mxu1  ;;  %v1139_v62 = vmul.f32 %v1116_v24, %v993_v60  ;;  %v1173_v9 = vmul.f32 %v2119_v25, %v994_v1 }
 0x1d6   : > { %v1172_v5 = vmul.f32 %v993_v60, %v970_v29  ;;  %v1159_v8 = vsel %vm1143_vm5, %v1140_v2, 0.0  ;;  %v2395_v29 = vmov 0  }
 0x1d7   : > { %v2138_v30 = vpop.f32.mrb[16].mxu0  ;;  %v1156_v4 = vsel %vm1143_vm5, %v1139_v62, 0.0  ;;  %v1191_v12 = vsel %vm1143_vm5, %v1173_v9, 0.0  ;;  %2319 = vset.pattern.permute.xlu1 %v2395_v29 }
 0x1d8   : > { %1177 = vadd.xlane.f32.xlu1 %v1176_v27  ;;  %v1142_v32 = vmul.f32 %v2138_v30, %v996_v28  ;;  %v1126_v33 = vpop.f32.mrb[17].mxu0  ;;  %v2122_v34 = vpop.f32.mrb[8].mxu1  ;;  %v1188_v10 = vsel %vm1143_vm5, %v1172_v5, 0.0 }
 0x1d9   : > { %v980_v38 = vpop.f32.mrb[9].mxu1  ;;  %v1141_v13 = vmul.f32 %v1126_v33, %v995_v11  ;;  %v1175_v16 = vmul.f32 %v2122_v34, %v996_v28 }
 0x1da   : > { %v1165_v39 = vsel %vm1143_vm5, %v1142_v32, 0.0  ;;  %v1174_v14 = vmul.f32 %v995_v11, %v980_v38 }
 0x1db   : > { %v1275_v41 = vpop.f32.mrb[18].mxu0  ;;  %v1162_v15 = vsel %vm1143_vm5, %v1141_v13, 0.0  ;;  %v1197_v18 = vsel %vm1143_vm5, %v1175_v16, 0.0 }
 0x1dc   : > { %v1279_v44 = vmul.f32 %v1275_v41, %v2754_v36  ;;  %1180 = vadd.xlane.f32.xlu1 %v1179_v37  ;;  %v2149_v45 = vpop.f32.mrb[19].mxu0  ;;  %v1194_v17 = vsel %vm1143_vm5, %v1174_v14, 0.0 }
 0x1de   : > { %v1280_v48 = vsel %vm1143_vm5, %v1279_v44, 0.0 }
 0x1df   : > { %1281 = vadd.xlane.f32.xlu0 %v1280_v48 }
 0x1e0   : > { %1151 = vadd.xlane.f32.xlu1 %v1150_v53 }
 0x1e4   : > { %1154 = vadd.xlane.f32.xlu1 %v1153_v55 }
 0x1e8   : > { %1183 = vadd.xlane.f32.xlu1 %v1182_v57 }
 0x1ec   : > { %1186 = vadd.xlane.f32.xlu1 %v1185_v61 }
 0x1f0   : > { %1157 = vadd.xlane.f32.xlu1 %v1156_v4 }
 0x1f4   : > { %1160 = vadd.xlane.f32.xlu1 %v1159_v8 }
 0x1f8   : > { %1189 = vadd.xlane.f32.xlu1 %v1188_v10 }
 0x1fc   : > { %1192 = vadd.xlane.f32.xlu1 %v1191_v12 }
 0x200   : > { %1163 = vadd.xlane.f32.xlu1 %v1162_v15 }
 0x204   : > { %1195 = vadd.xlane.f32.xlu1 %v1194_v17 }
 0x208   : > { %1198 = vadd.xlane.f32.xlu1 %v1197_v18 }
 0x20c   : > { %1284 = vxpose.xlu0.b32.start.end [1/1] (short) (narrow) %v2787_v19, 64 }
 0x255   : > { %1166 = vadd.xlane.f32.xlu0 %v1165_v39 }
 0x25d   : > { %v1146_v30 = vpop.xlane.xlu1 %1145 }
 0x261   : > { %v1149_v31 = vpop.xlane.xlu1 %1148 }
 0x265   : > { %v1178_v32 = vpop.xlane.xlu1 %1177 }
 0x266   : > { %v1445_v45 = vadd.f32 %v1178_v32, %v1146_v30 }
 0x269   : > { %v1181_v33 = vpop.xlane.xlu1 %1180 }
 0x26a   : > { %v1446_v43 = vadd.f32 %v1181_v33, %v1149_v31 }
 0x26c   : > { %v1282_v20 = vpop.xlane.xlu0 %1281 }
 0x26d   : > { %2150 = vmatprep.subr.mxu0 %v1282_v20  ;;  %v1152_v34 = vpop.xlane.xlu1 %1151 }
 0x26e   : > { %2151 = vmatpush3.msra.mxu0 %v1282_v20 }
 0x271   : > { %v1155_v37 = vpop.xlane.xlu1 %1154 }
 0x275   : > { %v1184_v38 = vpop.xlane.xlu1 %1183 }
 0x276   : > { %v1447_v62 = vadd.f32 %v1184_v38, %v1152_v34 }
 0x279   : > { %v1187_v39 = vpop.xlane.xlu1 %1186 }
 0x27a   : > { %v1448_v61 = vadd.f32 %v1187_v39, %v1155_v37 }
 0x27d   : > { %v1158_v40 = vpop.xlane.xlu1 %1157 }
 0x281   : > { %v1161_v41 = vpop.xlane.xlu1 %1160 }
 0x285   : > { %v1190_v44 = vpop.xlane.xlu1 %1189 }
 0x286   : > { %v1449_v14 = vadd.f32 %v1190_v44, %v1158_v40 }
 0x289   : > { %v1193_v56 = vpop.xlane.xlu1 %1192 }
 0x28a   : > { %v1450_v13 = vadd.f32 %v1193_v56, %v1161_v41 }
 0x28c   : > { %v1300_v21 = vpop.trf.xlu0 }
 0x28d   : > { %2152 = vmatprep.mubr.msk.f32.mxu0 %vm717_vm1, %v1300_v21  ;;  %v1164_v9 = vpop.xlane.xlu1 %1163 }
 0x290   : > { %v1301_v22 = vpop.trf.xlu0 }
 0x291   : > { %2153 = vmatmul.mubr.msk.f32.vlgmr.msra.gmra.mrb[20].mxu0 %vm717_vm1, %v1301_v22  ;;  %v1196_v16 = vpop.xlane.xlu1 %1195 }
 0x294   : > { %v1302_v23 = vpop.trf.xlu0 }
 0x295   : > { %2155 = vmatprep.mubr.msk.f32.mxu0 %vm717_vm1, %v1302_v23  ;;  %v1199_v23 = vpop.xlane.xlu1 %1198 }
 0x298   : > { %v1303_v24 = vpop.trf.xlu0 }
 0x299   : > { %2156 = vmatmul.mubr.msk.f32.gmra.mrb[22].mxu0 %vm717_vm1, %v1303_v24 }
 0x29c   : > { %v1304_v25 = vpop.trf.xlu0 }
 0x29d   : > { %2158 = vmatprep.mubr.msk.f32.mxu0 %vm717_vm1, %v1304_v25 }
 0x2a0   : > { %v1305_v26 = vpop.trf.xlu0 }
 0x2a1   : > { %2159 = vmatmul.mubr.msk.f32.gmra.mrb[24].mxu0 %vm717_vm1, %v1305_v26 }
 0x2a4   : > { %v1306_v27 = vpop.trf.xlu0 }
 0x2a5   : > { %2161 = vmatprep.mubr.msk.f32.mxu0 %vm717_vm1, %v1306_v27  ;;  %v1451_v27 = vadd.f32 %v1196_v16, %v1164_v9 }
 0x2a8   : > { %v1307_v28 = vpop.trf.xlu0 }
 0x2a9   : > { %2162 = vmatmul.mubr.msk.f32.gmra.mrb[26].mxu0 %vm717_vm1, %v1307_v28 }
 0x2e2   : > { %v1167_v24 = vpop.xlane.xlu0 %1166 }
 0x2e3   : > { %v1452_v28 = vadd.f32 %v1199_v23, %v1167_v24 }
 0x364   : > { %v2154_v48 = vpop.f32.mrb[20].mxu0 }
 0x365   : > { %v1454_v49 = vadd.f32 %v2154_v48, %v1446_v43  ;;  %v1406_v53 = vpop.f32.mrb[21].mxu0 }
 0x366   : > { %v1453_v54 = vadd.f32 %v1445_v45, %v1406_v53 }
 0x367   : > { %v1470_v55 = vmul.f32 0.2, %v1454_v49  ;;  %vm1462_vm6 = vcmp.gt.f32.partialorder %v1454_v49, 0.0 }
 0x368   : > { %v1469_v57 = vmul.f32 0.2, %v1453_v54  ;;  %vm1461_vm7 = vcmp.gt.f32.partialorder %v1453_v54, 0.0 }
 0x369   : > { %v1478_v60 = vsel %vm1462_vm6, %v1454_v49, %v1470_v55 }
 0x36a   : > { %1492 = vperm.xlu1 %2319, %v1478_v60   ;;  %v1477_v5 = vsel %vm1461_vm7, %v1453_v54, %v1469_v57 }
 0x36c   : > { %v2157_v1 = vpop.f32.mrb[22].mxu0 }
 0x36d   : > { %v1456_v2 = vadd.f32 %v2157_v1, %v1448_v61  ;;  %v1416_v4 = vpop.f32.mrb[23].mxu0 }
 0x36e   : > { %v1455_v8 = vadd.f32 %v1447_v62, %v1416_v4  ;;  %1487 = vperm.xlu1 %2319, %v1477_v5  }
 0x36f   : > { %v1472_v10 = vmul.f32 0.2, %v1456_v2  ;;  %vm1464_vm8 = vcmp.gt.f32.partialorder %v1456_v2, 0.0 }
 0x370   : > { %v1471_v11 = vmul.f32 0.2, %v1455_v8  ;;  %vm1463_vm9 = vcmp.gt.f32.partialorder %v1455_v8, 0.0 }
 0x371   : > { %v1480_v12 = vsel %vm1464_vm8, %v1456_v2, %v1472_v10  ;;  %v1622_v2 = vld [vmem:[%s2906_s9] sm:$0xff] }
 0x372   : > { %1502 = vperm.xlu1 %2319, %v1480_v12   ;;  %v1479_v20 = vsel %vm1463_vm9, %v1455_v8, %v1471_v11 }
 0x374   : > { %v2160_v15 = vpop.f32.mrb[24].mxu0 }
 0x375   : > { %v1458_v17 = vadd.f32 %v2160_v15, %v1450_v13  ;;  %v1426_v18 = vpop.f32.mrb[25].mxu0  ;;  %v2397_v13 = vmov 1  }
 0x376   : > { %v1457_v21 = vadd.f32 %v1449_v14, %v1426_v18  ;;  %1497 = vperm.xlu1 %2319, %v1479_v20   ;;  %2320 = vset.pattern.permute.xlu0 %v2397_v13  ;;  %v1964_v20 = vld [vmem:[%s2911_s14] ss:$0 sm:$0xff] }
 0x377   : > { %v1474_v22 = vmul.f32 0.2, %v1458_v17  ;;  %vm1466_vm10 = vcmp.gt.f32.partialorder %v1458_v17, 0.0 }
 0x378   : > { %v1473_v25 = vmul.f32 0.2, %v1457_v21  ;;  %vm1465_vm11 = vcmp.gt.f32.partialorder %v1457_v21, 0.0 }
 0x379   : > { %v1482_v26 = vsel %vm1466_vm10, %v1458_v17, %v1474_v22 }
 0x37a   : > { %1512 = vperm.xlu1 %2319, %v1482_v26   ;;  %v1481_v32 = vsel %vm1465_vm11, %v1457_v21, %v1473_v25 }
 0x37c   : > { %v2163_v30 = vpop.f32.mrb[26].mxu0 }
 0x37d   : > { %v1436_v31 = vpop.f32.mrb[27].mxu0  ;;  %v1460_v33 = vadd.f32 %v2163_v30, %v1452_v28 }
 0x37e   : > { %v1459_v34 = vadd.f32 %v1451_v27, %v1436_v31  ;;  %1507 = vperm.xlu1 %2319, %v1481_v32  }
 0x37f   : > { %v1476_v38 = vmul.f32 0.2, %v1460_v33  ;;  %vm1468_vm13 = vcmp.gt.f32.partialorder %v1460_v33, 0.0 }
 0x380   : > { %v1475_v37 = vmul.f32 0.2, %v1459_v34  ;;  %vm1467_vm12 = vcmp.gt.f32.partialorder %v1459_v34, 0.0 }
 0x381   : > { %v1484_v40 = vsel %vm1468_vm13, %v1460_v33, %v1476_v38 }
 0x382   : > { %v1483_v39 = vsel %vm1467_vm12, %v1459_v34, %v1475_v37 }
 0x383   : > { %1517 = vperm.xlu1 %2319, %v1483_v39  }
 0x387   : > { %1522 = vperm.xlu1 %2319, %v1484_v40  }
 0x3e9   : > { %v1493_v41 = vpop.permute.xlu1 %1492 }
 0x3ea   : > { %v1526_v44 = vmul.f32 %v1493_v41, %v2657_v51 }
 0x3ed   : > { %v1488_v43 = vpop.permute.xlu1 %1487 }
 0x3ee   : > { %v1525_v45 = vmul.f32 %v1488_v43, %v2625_v35 }
 0x3f0   : > { %v2252_v48 = vpack.c.bf16 %v1526_v44, %v1525_v45 }
 0x3f1   : > { %v1503_v49 = vpop.permute.xlu1 %1502 }
 0x3f2   : > { %2253 = vmatpush3.bf16.msra.mxu1 %v2252_v48  ;;  %v1528_v54 = vmul.f32 %v1503_v49, %v2680_v58 }
 0x3f3   : > { %2254 = vmatprep.subr.bf16.mxu1 %v2392_v42 }
 0x3f5   : > { %v1498_v53 = vpop.permute.xlu1 %1497 }
 0x3f6   : > { %v1527_v55 = vmul.f32 %v1498_v53, %v2662_v52 }
 0x3f8   : > { %v2255_v56 = vpack.c.bf16 %v1528_v54, %v1527_v55 }
 0x3f9   : > { %v1513_v57 = vpop.permute.xlu1 %1512 }
 0x3fa   : > { %2256 = vmatpush3.bf16.msra.mxu1 %v2255_v56  ;;  %v1530_v51 = vmul.f32 %v1513_v57, %v2698_v63  ;;  %v1623_v63 = vld [vmem:[%s2906_s9 + $0x8] sm:$0xff] }
 0x3fb   : > { %2257 = vmatprep.subr.bf16.mxu1 %v2392_v42 }
 0x3fd   : > { %v1508_v60 = vpop.permute.xlu1 %1507 }
 0x3fe   : > { %v1529_v35 = vmul.f32 %v1508_v60, %v2686_v59  ;;  %v2264_v59 = vpack.c.bf16 %v1623_v63, %v1622_v2 }
 0x400   : > { %v2258_v61 = vpack.c.bf16 %v1530_v51, %v1529_v35 }
 0x402   : > { %2259 = vmatpush3.bf16.msra.mxu1 %v2258_v61  ;;  %v1518_v62 = vpop.permute.xlu1 %1517 }
 0x403   : > { %2260 = vmatprep.subr.bf16.mxu1 %v2392_v42  ;;  %v1531_v58 = vmul.f32 %v1518_v62, %v2704_v0  ;;  %v1624_v0 = vld [vmem:[%s2906_s9 + $0x10] sm:$0xff] }
 0x406   : > { %v1523_v1 = vpop.permute.xlu1 %1522 }
 0x407   : > { %v1532_v52 = vmul.f32 %v1523_v1, %v2716_v3  ;;  %v1625_v3 = vld [vmem:[%s2906_s9 + $0x18] sm:$0xff] }
 0x408   : > { %v2267_v5 = vpack.c.bf16 %v1625_v3, %v1624_v0 }
 0x409   : > { %v2261_v4 = vpack.c.bf16 %v1532_v52, %v1531_v58 }
 0x40b   : > { %2262 = vmatpush3.bf16.msra.mxu1 %v2261_v4 }
 0x40c   : > { %2263 = vmatprep.subr.bf16.mxu1 %v2392_v42 }
 0x40e   : > { %2181 = vmatmul.mubr.msk.f32.vlgmr.msra.gmra.mrb[10].mxu1 %vm1533_vm14, %v2787_v19  ;;  %v1607_v19 = vld [vmem:[%s540_s24] sm:$0xff] }
 0x40f   : > { %2265 = vmatpush3.bf16.msra.mxu1 %v2264_v59  ;;  %2191 = vmatprep.mubr.msk.f32.mxu1 %vm2393_vm4, %v2394_v6  ;;  %vm1608_vm15 = vcmp.gt.f32.partialorder %v1607_v19, 0.5 }
 0x410   : > { %2266 = vmatprep.subr.bf16.mxu1 %v2392_v42 }
 0x413   : > { %2268 = vmatpush3.bf16.msra.mxu1 %v2267_v5 }
 0x414   : > { %2269 = vmatprep.subr.bf16.mxu1 %v2392_v42 }
 0x416   : > { %2192 = vmatmul.mubr.msk.f32.vlgmr.msra.gmra.mrb[12].mxu1 %vm547_vm0, %v2728_v7 }
 0x417   : > { %2271 = vmatpush3.bf16.msra.mxu1 %v2270_v50  ;;  %2198 = vmatprep.mubr.msk.f32.mxu1 %vm2393_vm4, %v2394_v6  ;;  %v2396_v6 = vmov 2  }
 0x418   : > { %2321 = vset.pattern.permute.xlu1 %v2396_v6 }
 0x4e1   : > { %v1603_v8 = vpop.f32.mrb[10].mxu1 }
 0x4e2   : > { %v1609_v9 = vsel %vm1608_vm15, %v1603_v8, -1e+30  ;;  %v2182_v10 = vpop.f32.mrb[11].mxu1 }
 0x4e3   : > { %v1610_v42 = vsel %vm1005_vm2, %v1609_v9, -inf }
 0x4e4   : > { %1611 = vmax.xlane.f32.xlu1 %v1610_v42 }
 0x4e9   : > { %v1692_v50 = vpop.f32.mrb[12].mxu1 }
 0x4ea   : > { %v2193_v14 = vpop.f32.mrb[13].mxu1 }
 0x4f5   : > { %1795 = vperm.xlu1 %2321, %v2754_v36  }
 0x4f9   : > { %2322 = vset.pattern.permute.xlu1 %v2395_v29 }
 0x4fa   : > { %1779 = vperm.xlu1 %2322, %v2754_v36  }
 0x571   : > { %v1612_v7 = vpop.xlane.xlu1 %1611 }
 0x572   : > { %v1613_v11 = vsub.f32 %v1609_v9, %v1612_v7 }
 0x574   : > { %v1614_v12 = vmul.f32 1.442695, %v1613_v11 }
 0x576   : > { %2324 = vpow2.f32 %v1614_v12 }
 0x580   : > { %v2325_v46 = vpop.eup %2324 }
 0x581   : > { %v1616_v47 = vsel %vm1005_vm2, %v2325_v46, 0.0 }
 0x582   : > { %1617 = vadd.xlane.f32.xlu0 %v1616_v47 }
 0x598   : > { %1785 = vperm.xlu0 %2320, %v2754_v36   ;;  %v1796_v36 = vpop.permute.xlu1 %1795 }
 0x59c   : > { %2323 = vset.pattern.permute.xlu0 %v2396_v6  ;;  %v1780_v26 = vpop.permute.xlu1 %1779 }
 0x60f   : > { %v1618_v15 = vpop.xlane.xlu0 %1617 }
 0x610   : > { %2326 = vrcp.f32 %v1618_v15 }
 0x617   : > { %v1786_v23 = vpop.permute.xlu0 %1785 }
 0x61a   : > { %v2327_v16 = vpop.eup %2326 }
 0x61b   : > { %v1621_v17 = vmul.f32 %v2327_v16, %v2325_v46 }
 0x61d   : > { %2199 = vmatmul.mubr.msk.f32.vlgmr.msra.gmra.mrb[14].mxu1 %vm1005_vm2, %v1621_v17 }
 0x6f0   : > { %v1765_v18 = vpop.f32.mrb[14].mxu1 }
 0x6f1   : > { %v1766_v21 = vadd.f32 %v1765_v18, %v1692_v50  ;;  %v2200_v22 = vpop.f32.mrb[15].mxu1 }
 0x6f3   : > { %v1776_v29 = vadd.f32 %v1964_v20, %v1766_v21 }
 0x6f5   : > { %v1788_v24 = vmul.f32 %v1786_v23, %v1776_v29  ;;  %v1798_v25 = vmul.f32 %v1796_v36, %v1776_v29  ;;  %v1782_v28 = vmul.f32 %v1780_v26, %v1776_v29 }
 0x6f7   : > { %1790 = vrot.lane.b32.xlu1 %v1788_v24, %s2398_s29  ;;  %s1807_s29 = scalar_lea.sflag [#allocation3], %s522_s16 }
 0x6fb   : > { %1800 = vrot.lane.b32.xlu1 %v1798_v25, %s2399_s30  ;;  %s2328_s30 = scalar_lea.vmem %s2856_s20, 128 }
 0x6fc   : > { %p2329_p11 = scmp.ne.s32.totalorder %s2856_s20, %s2328_s30  ;;  %p2336_p1 = scmp.lt.s32.totalorder %s2334_s0, %s2328_s30 }
 0x6fe   : > { %p2330_p12 = pnand %p2329_p11, %p2519_p5  ;;  %p2337_p2 = por %p2336_p1, %p2335_p0 }
 0x700   : > { %p2331_p13 = pneg %p2330_p12 }
 0x702   : > { %p2338_p3 = pnand %p2337_p2, %p2331_p13 }
 0x769   : > { %v1791_v27 = vpop.permute.xlu1 %1790 }
 0x76a   : > { %v1793_v30 = vadd.f32 %v1791_v27, %v1782_v28 }
 0x76d   : > { %v1801_v31 = vpop.permute.xlu1 %1800 }
 0x76e   : > { %v1803_v32 = vadd.f32 %v1801_v31, %v1793_v30 }
 0x770   : > { %v1804_v33 = vmax.f32 %v1803_v32, 0.0 }
 0x772   : > { %1805 = vst.msk [vmem:[%s524_s25] sm:$0xff] %vm547_vm0, %v1804_v33 }
 0x773   : > { %2341 = shalt.err (!%p2338_p3)
}
 0x774   : > { %s2342_s16 = scalar_lea.hbm %s2854_s27, 128  ;;  %s2346_s24 = scalar_lea.hbm %s2912_s15, 256 }
 0x775   : > { %p2343_p4 = scmp.ne.s32.totalorder %s2854_s27, %s2342_s16  ;;  %p2347_p9 = scmp.lt.u32.totalorder %s2854_s27, %s2912_s15 }
 0x776   : > { %p2348_p10 = scmp.lt.u32.totalorder %s2346_s24, %s2342_s16  ;;  %p2350_p12 = scmp.lt.u32.totalorder %s2342_s16, %s2854_s27 }
 0x777   : > { %p2344_p7 = pnand %p2343_p4, %p2519_p5 }
 0x778   : > { %p2349_p11 = por %p2348_p10, %p2347_p9 }
 0x779   : > { %p2345_p8 = pneg %p2344_p7 }
 0x77a   : > { %p2351_p13 = por %p2350_p12, %p2349_p11 }
 0x77c   : > { %p2352_p0 = pnand %p2351_p13, %p2345_p8 }
 0x77e   : > { %2355 = shalt.err (!%p2352_p0)
}
 0x77f   : > { %2272 = dma.vmem_to_hbm [thread:$0]  (%p2519_p5), %s2856_s20, 128, %s2854_s27, %s1807_s29  }
 0x780 PF: > { %p2278_p1 = scmp.ge.s32.totalorder %s2390_s21, 2  ;;  %s1832_s30 = sand.u32 1, %s2378_s18  }
 0x781   : > { %s1833_s17 = scalar_lea.sflag [#allocation3], %s1832_s30 }
 0x782   : > { %p2275_p2 = pnand %p2278_p1, %p2523_p6 }
 0x784   : > { %2373 = dma.done.wait (!%p2275_p2), %s1833_s17, 128  }
 0x785   : > { %2375 = vsyncadd (!%p2275_p2), %s1833_s17, 4294967168  ;;  %s2926_s21 = sld [smem:[#allocation6_spill]]  ;;  %s2927_s16 = sld [smem:[#allocation5_spill]] }
 0x786   : > { %s2928_s20 = sld [smem:[#allocation7_spill]]  ;;  %s2929_s18 = smov %s2382_s19 }
 0x78b   : > { %p25_p3 = scmp.ge.s32.totalorder %s2926_s21, 4   ;;  %s2930_s19 = smov %s2927_s16 }
 0x78d   :  { %27 = sbr.rel (!%p25_p3) target bundleno = 5 (0x5), region = 124 }
 0x794   :  { %1838 = vsyncpa [#allocation3], 1 }
 0x795   :  { %1840 = vsyncpa [#allocation3 + $0x1], 1 }

</bundles_post_ra>
